<compile_context>
chip_gen: v5e
topology: v5e:2x2
jax: 0.10.0
libtpu: 0.0.40
codegen_flags: <defaults>
</compile_context>

<pallas_src>
import jax
import jax.numpy as jnp
from jax import lax
from jax.experimental import pallas as pl
from jax.experimental.pallas import tpu as pltpu


def state_encoder_kernel(fm_ref, pose_ref, w1fx_ref, w1p_ref, b1_ref,
                         w2_ref, b2_ref, out_ref):
    # fm_ref is (TV, F*SS), lane-dense; the global average pool is already
    # folded into w1fx_ref (repeated & pre-scaled by 1/SS), so layer 1 is just
    # two GEMMs on the split weight (the (V, F+P) concat is never built).
    fm = fm_ref[...].astype(jnp.float32)                               # (TV, F*SS)
    poses = pose_ref[...].astype(jnp.float32)                          # (TV, P)

    # --- layer 1: [pool(fm), poses] @ W1^T + b1 ------------------------------
    h1 = (jnp.dot(fm, w1fx_ref[...], preferred_element_type=jnp.float32)
          + jnp.dot(poses, w1p_ref[...], preferred_element_type=jnp.float32)
          + b1_ref[...])
    h1 = jnp.maximum(h1, 0.0)                                           # ReLU

    # --- layer 2 (+ final ReLU, build_mlp final_nonlinearity=True) ----------
    h2 = (jnp.dot(h1, w2_ref[...], preferred_element_type=jnp.float32)
          + b2_ref[...])
    h2 = jnp.maximum(h2, 0.0)

    out_ref[...] = h2.astype(out_ref.dtype)


def state_encoder_forward(feat_map, poses, params, *, v_tile=None):
    """Pallas StateEncoder.forward.

    feat_map : (V, F, S, S)  resnet18 feature map (pre avg-pool), native layout
    poses    : (V, P)
    params   : torch-layout weights: w1 (P, F+P), b1 (P,), w2 (P, P), b2 (P,)
    v_tile   : rows per grid step.  None (default) -> single tile; on v7x with
               V >= 16 pass a multiple of 8 dividing V (e.g. round_up(V//2, 8))
               so both TensorCores get a "parallel" block.
    returns  : (1, V, P)
    """
    V, F, S, _ = feat_map.shape
    P = poses.shape[-1]
    SS = S * S
    K = F * SS

    # Native contiguous (V, F, S, S) -> (V, F*SS): metadata-only reshape, no
    # HBM rewrite, lane-dense last dim.
    fm_flat = feat_map.reshape(V, K)

    # Fold avg-pool + transpose into the weight at trace time:
    #   mean_s(fm) @ W1f^T == fm_flat @ (repeat(W1f^T, SS, axis=0) / SS)
    w1 = params["w1"]                                     # (P, F + P), torch (out, in)
    w1f_x = jnp.repeat(jnp.transpose(w1[:, :F]), SS, axis=0) / SS   # (F*SS, P)
    w1p_t = jnp.transpose(w1[:, F:])                      # (P, P)  pose half
    b1 = params["b1"][None, :]                            # (1, P)
    w2_t = jnp.transpose(params["w2"])                    # (P, P)
    b2 = params["b2"][None, :]                            # (1, P)

    # v_tile validation: must keep the (tv, P) blocks legal (tv multiple of 8
    # or == V) and avoid padded partial blocks (V % tv == 0).
    if v_tile is None or v_tile >= V:
        tv = V
    else:
        if v_tile % 8 != 0 or V % v_tile != 0:
            raise ValueError(
                f"v_tile={v_tile} must be None, >= V, or a multiple of 8 that "
                f"divides V={V} (BlockSpec sublane rule / partial-block guard).")
        tv = v_tile

    grid = (pl.cdiv(V, tv),)             # independent V-tiles ("parallel")

    # VMEM: fm tile = tv*K*4 bytes (bf16: /2), double-buffered; weights
    # ~ (K + 2*P + 2)*P*4 bytes resident.  At demo shapes this is < 0.5 MiB --
    # far under the scoped limits (16 MiB v5e, 32 MiB v6e/v7x).
    out = pl.pallas_call(
        state_encoder_kernel,
        out_shape=jax.ShapeDtypeStruct((V, P), poses.dtype),
        grid=grid,
        in_specs=[
            pl.BlockSpec((tv, K), lambda i: (i, 0)),      # flat feature-map tile
            pl.BlockSpec((tv, P), lambda i: (i, 0)),      # poses tile
            pl.BlockSpec((K, P), lambda i: (0, 0)),       # expanded W1 feat half (resident)
            pl.BlockSpec((P, P), lambda i: (0, 0)),       # W1 pose half^T (resident)
            pl.BlockSpec((1, P), lambda i: (0, 0)),       # b1 (resident)
            pl.BlockSpec((P, P), lambda i: (0, 0)),       # W2^T (resident)
            pl.BlockSpec((1, P), lambda i: (0, 0)),       # b2 (resident)
        ],
        out_specs=pl.BlockSpec((tv, P), lambda i: (i, 0)),
        compiler_params=pltpu.CompilerParams(
            dimension_semantics=("parallel",)),           # rows independent
    )(fm_flat, poses, w1f_x, w1p_t, b1, w2_t, b2)

    return out.reshape(1, V, P)


def reference_forward(feat_map, poses, params):
    """Pure-JAX reference matching the torch module semantics."""
    V, F, S, _ = feat_map.shape
    feat = feat_map.reshape(V, F, S * S).mean(axis=-1)          # global avg pool
    x = jnp.concatenate([feat, poses], axis=-1)
    hp = lax.Precision.HIGHEST
    h1 = jnp.maximum(jnp.dot(x, params["w1"].T, precision=hp) + params["b1"], 0.0)
    h2 = jnp.maximum(jnp.dot(h1, params["w2"].T, precision=hp) + params["b2"], 0.0)
    return h2.reshape(1, V, -1)


if __name__ == "__main__":
    # Small shapes implied by the module: V views, resnet18 feat_dim=512 with a
    # 2x2 layer-4 map (64x64 input), pose_dim=32, nlayers=2 MLP.
    V, F, P, S = 8, 512, 32, 2

    key = jax.random.PRNGKey(0)
    k_fm, k_pose, k1, k2, k3, k4 = jax.random.split(key, 6)

    # TODO(synk): image -> feat_map goes through the pretrained resnet18
    # backbone, which cannot be built in-script; start from the feature map.
    feat_map = jax.random.normal(k_fm, (V, F, S, S), dtype=jnp.float32)
    poses = jax.random.normal(k_pose, (V, P), dtype=jnp.float32)

    # PyTorch nn.Linear default init: U(-1/sqrt(fan_in), 1/sqrt(fan_in))
    s1 = 1.0 / jnp.sqrt(F + P)
    s2 = 1.0 / jnp.sqrt(P)
    params = {
        "w1": jax.random.uniform(k1, (P, F + P), jnp.float32, -s1, s1),
        "b1": jax.random.uniform(k2, (P,), jnp.float32, -s1, s1),
        "w2": jax.random.uniform(k3, (P, P), jnp.float32, -s2, s2),
        "b2": jax.random.uniform(k4, (P,), jnp.float32, -s2, s2),
    }

    out = jax.block_until_ready(state_encoder_forward(feat_map, poses, params))
    out_ref = reference_forward(feat_map, poses, params)

    assert out.shape == (1, V, P)
    max_err = float(jnp.max(jnp.abs(out - out_ref)))
    assert jnp.allclose(out, out_ref, atol=5e-4, rtol=5e-4), f"max_err={max_err}"

    print("KERNEL_OK")
</pallas_src>

<mosaic_0001>
module attributes {stable_mosaic.version = 11 : i64} {
  func.func @state_encoder_kernel(%arg0: i32, %arg1: memref<8x2048xf32, #tpu.memory_space<vmem>>, %arg2: memref<8x32xf32, #tpu.memory_space<vmem>>, %arg3: memref<2048x32xf32, #tpu.memory_space<vmem>>, %arg4: memref<32x32xf32, #tpu.memory_space<vmem>>, %arg5: memref<1x32xf32, #tpu.memory_space<vmem>>, %arg6: memref<32x32xf32, #tpu.memory_space<vmem>>, %arg7: memref<1x32xf32, #tpu.memory_space<vmem>>, %arg8: memref<8x32xf32, #tpu.memory_space<vmem>>) attributes {dimension_semantics = [#tpu.dimension_semantics<parallel>], iteration_bounds = array<i64: 1>, scalar_prefetch = 0 : i64, scratch_operands = 0 : i64, tpu.core_type = #tpu.core_type<tc>, window_params = [{transform_indices = @transform_0, window_bounds = array<i64: 8, 2048>}, {transform_indices = @transform_1, window_bounds = array<i64: 8, 32>}, {pipeline_mode = #tpu.pipeline_mode<synchronous>, transform_indices = @transform_2, window_bounds = array<i64: 2048, 32>}, {pipeline_mode = #tpu.pipeline_mode<synchronous>, transform_indices = @transform_3, window_bounds = array<i64: 32, 32>}, {pipeline_mode = #tpu.pipeline_mode<synchronous>, transform_indices = @transform_4, window_bounds = array<i64: 1, 32>}, {pipeline_mode = #tpu.pipeline_mode<synchronous>, transform_indices = @transform_5, window_bounds = array<i64: 32, 32>}, {pipeline_mode = #tpu.pipeline_mode<synchronous>, transform_indices = @transform_6, window_bounds = array<i64: 1, 32>}, {transform_indices = @transform_7, window_bounds = array<i64: 8, 32>}]} {
    %c0 = arith.constant 0 : index
    %c0_0 = arith.constant 0 : index
    %0 = vector.load %arg1[%c0, %c0_0] : memref<8x2048xf32, #tpu.memory_space<vmem>>, vector<8x2048xf32>
    %c0_1 = arith.constant 0 : index
    %c0_2 = arith.constant 0 : index
    %1 = vector.load %arg2[%c0_1, %c0_2] : memref<8x32xf32, #tpu.memory_space<vmem>>, vector<8x32xf32>
    %c0_3 = arith.constant 0 : index
    %c0_4 = arith.constant 0 : index
    %2 = vector.load %arg3[%c0_3, %c0_4] : memref<2048x32xf32, #tpu.memory_space<vmem>>, vector<2048x32xf32>
    %cst = arith.constant dense<0.000000e+00> : vector<8x32xf32>
    %3 = tpu.matmul %0, %2, %cst {dimension_numbers = #tpu.dot_dimension_numbers<[1], [0], [0], [1], [0, 0, 1, 1], [], []>} : vector<8x2048xf32>, vector<2048x32xf32>, vector<8x32xf32> -> vector<8x32xf32>
    %c0_5 = arith.constant 0 : index
    %c0_6 = arith.constant 0 : index
    %4 = vector.load %arg4[%c0_5, %c0_6] : memref<32x32xf32, #tpu.memory_space<vmem>>, vector<32x32xf32>
    %cst_7 = arith.constant dense<0.000000e+00> : vector<8x32xf32>
    %5 = tpu.matmul %1, %4, %cst_7 {dimension_numbers = #tpu.dot_dimension_numbers<[1], [0], [0], [1], [0, 0, 1, 1], [], []>} : vector<8x32xf32>, vector<32x32xf32>, vector<8x32xf32> -> vector<8x32xf32>
    %6 = arith.addf %3, %5 : vector<8x32xf32>
    %c0_8 = arith.constant 0 : index
    %c0_9 = arith.constant 0 : index
    %7 = vector.load %arg5[%c0_8, %c0_9] : memref<1x32xf32, #tpu.memory_space<vmem>>, vector<1x32xf32>
    %8 = vector.broadcast %7 : vector<1x32xf32> to vector<8x32xf32>
    %9 = arith.addf %6, %8 : vector<8x32xf32>
    %cst_10 = arith.constant 0.000000e+00 : f32
    %10 = vector.broadcast %cst_10 : f32 to vector<8x32xf32>
    %11 = arith.maximumf %9, %10 : vector<8x32xf32>
    %c0_11 = arith.constant 0 : index
    %c0_12 = arith.constant 0 : index
    %12 = vector.load %arg6[%c0_11, %c0_12] : memref<32x32xf32, #tpu.memory_space<vmem>>, vector<32x32xf32>
    %cst_13 = arith.constant dense<0.000000e+00> : vector<8x32xf32>
    %13 = tpu.matmul %11, %12, %cst_13 {dimension_numbers = #tpu.dot_dimension_numbers<[1], [0], [0], [1], [0, 0, 1, 1], [], []>} : vector<8x32xf32>, vector<32x32xf32>, vector<8x32xf32> -> vector<8x32xf32>
    %c0_14 = arith.constant 0 : index
    %c0_15 = arith.constant 0 : index
    %14 = vector.load %arg7[%c0_14, %c0_15] : memref<1x32xf32, #tpu.memory_space<vmem>>, vector<1x32xf32>
    %15 = vector.broadcast %14 : vector<1x32xf32> to vector<8x32xf32>
    %16 = arith.addf %13, %15 : vector<8x32xf32>
    %cst_16 = arith.constant 0.000000e+00 : f32
    %17 = vector.broadcast %cst_16 : f32 to vector<8x32xf32>
    %18 = arith.maximumf %16, %17 : vector<8x32xf32>
    %c0_17 = arith.constant 0 : index
    %c0_18 = arith.constant 0 : index
    %19 = vector.load %arg8[%c0_17, %c0_18] : memref<8x32xf32, #tpu.memory_space<vmem>>, vector<8x32xf32>
    tpu.vector_store %arg8[%c0_17, %c0_18], %18 {strides = array<i32>} : memref<8x32xf32, #tpu.memory_space<vmem>>, vector<8x32xf32>,
    return
  }
  func.func @transform_0(%arg0: i32) -> (i32, i32) {
    %c0_i32 = arith.constant 0 : i32
    %c0_i32_0 = arith.constant 0 : i32
    return %arg0, %c0_i32 : i32, i32
  }
  func.func @transform_1(%arg0: i32) -> (i32, i32) {
    %c0_i32 = arith.constant 0 : i32
    %c0_i32_0 = arith.constant 0 : i32
    return %arg0, %c0_i32 : i32, i32
  }
  func.func @transform_2(%arg0: i32) -> (i32, i32) {
    %c0_i32 = arith.constant 0 : i32
    %c0_i32_0 = arith.constant 0 : i32
    %c0_i32_1 = arith.constant 0 : i32
    return %c0_i32, %c0_i32_0 : i32, i32
  }
  func.func @transform_3(%arg0: i32) -> (i32, i32) {
    %c0_i32 = arith.constant 0 : i32
    %c0_i32_0 = arith.constant 0 : i32
    %c0_i32_1 = arith.constant 0 : i32
    return %c0_i32, %c0_i32_0 : i32, i32
  }
  func.func @transform_4(%arg0: i32) -> (i32, i32) {
    %c0_i32 = arith.constant 0 : i32
    %c0_i32_0 = arith.constant 0 : i32
    %c0_i32_1 = arith.constant 0 : i32
    return %c0_i32, %c0_i32_0 : i32, i32
  }
  func.func @transform_5(%arg0: i32) -> (i32, i32) {
    %c0_i32 = arith.constant 0 : i32
    %c0_i32_0 = arith.constant 0 : i32
    %c0_i32_1 = arith.constant 0 : i32
    return %c0_i32, %c0_i32_0 : i32, i32
  }
  func.func @transform_6(%arg0: i32) -> (i32, i32) {
    %c0_i32 = arith.constant 0 : i32
    %c0_i32_0 = arith.constant 0 : i32
    %c0_i32_1 = arith.constant 0 : i32
    return %c0_i32, %c0_i32_0 : i32, i32
  }
  func.func @transform_7(%arg0: i32) -> (i32, i32) {
    %c0_i32 = arith.constant 0 : i32
    %c0_i32_0 = arith.constant 0 : i32
    return %arg0, %c0_i32 : i32, i32
  }
}

</mosaic_0001>

<bundles_post_ra>
// kernel: tpu_custom_call.1
= control target key start
LH: loop header
LB: loop body
LE: loop exit
PB: predicated region body
PF: predicated region fallthrough
CT: control target
= control target key end

     0   :  { %vm304_vm0 = vcmask 261120   ;;  %s1630_s0 = inlined_call_operand.vmem [shape: f32[8,2048], index: 0, kind: input, shape index: {}]   ;;  %s1631_s1 = inlined_call_operand.vmem [shape: f32[8,32], index: 1, kind: input, shape index: {}]   ;;  %s1632_s2 = inlined_call_operand.vmem [shape: f32[2048,32], index: 2, kind: input, shape index: {}]   ;;  %s1633_s3 = inlined_call_operand.vmem [shape: f32[32,32], index: 3, kind: input, shape index: {}]   ;;  %s1634_s4 = inlined_call_operand.vmem [shape: f32[1,32], index: 4, kind: input, shape index: {}]   ;;  %s1635_s5 = inlined_call_operand.vmem [shape: f32[32,32], index: 5, kind: input, shape index: {}]   ;;  %s1636_s6 = inlined_call_operand.vmem [shape: f32[1,32], index: 6, kind: input, shape index: {}]   ;;  %s1637_s7 = inlined_call_operand.hbm [shape: f32[8,32], index: 7, kind: output, shape index: {}]  }
   0x1   :  { %v59_v0 = vld [vmem:[%s1632_s2 + $0x78] sm:$0xff]  ;;  %v58_v2 = vld [vmem:[%s1632_s2 + $0x70] sm:$0xff]  ;;  %v57_v6 = vld [vmem:[%s1632_s2 + $0x68] sm:$0xff] }
   0x2   :  { %v75_v1 = vld [vmem:[%s1632_s2 + $0xf8] sm:$0xff]  ;;  %328 = vmatpush.msra.mxu1 %v59_v0  ;;  %v74_v3 = vld [vmem:[%s1632_s2 + $0xf0] sm:$0xff]  ;;  %v73_v7 = vld [vmem:[%s1632_s2 + $0xe8] sm:$0xff] }
   0x3   :  { %348 = vmatpush.msra.mxu2 %v75_v1  ;;  %v91_v4 = vld [vmem:[%s1632_s2 + $0x178] sm:$0xff]  ;;  %v90_v8 = vld [vmem:[%s1632_s2 + $0x170] sm:$0xff]  ;;  %v56_v10 = vld [vmem:[%s1632_s2 + $0x60] sm:$0xff] }
   0x4   :  { %v303_v5 = vld [vmem:[%s1633_s3 + $0x18] sm:$0xff]  ;;  %368 = vmatpush.msra.mxu3 %v91_v4  ;;  %329 = vmatpush.msra.mxu1 %v58_v2  ;;  %v302_v9 = vld [vmem:[%s1633_s3 + $0x10] sm:$0xff]  ;;  %v72_v11 = vld [vmem:[%s1632_s2 + $0xe0] sm:$0xff] }
   0x5   :  { %320 = vmatpush.msra.mxu0 %v303_v5  ;;  %349 = vmatpush.msra.mxu2 %v74_v3  ;;  %v89_v12 = vld [vmem:[%s1632_s2 + $0x168] sm:$0xff]  ;;  %v88_v14 = vld [vmem:[%s1632_s2 + $0x160] sm:$0xff]  ;;  %v55_v16 = vld [vmem:[%s1632_s2 + $0x58] sm:$0xff] }
   0x6   :  { %369 = vmatpush.msra.mxu3 %v90_v8  ;;  %v301_v13 = vld [vmem:[%s1633_s3 + $0x8] sm:$0xff]  ;;  %330 = vmatpush.msra.mxu1 %v57_v6  ;;  %v300_v15 = vld [vmem:[%s1633_s3] sm:$0xff]  ;;  %v71_v17 = vld [vmem:[%s1632_s2 + $0xd8] sm:$0xff] }
   0x7   :  { %321 = vmatpush.msra.mxu0 %v302_v9  ;;  %350 = vmatpush.msra.mxu2 %v73_v7  ;;  %v87_v18 = vld [vmem:[%s1632_s2 + $0x158] sm:$0xff]  ;;  %v54_v20 = vld [vmem:[%s1632_s2 + $0x50] sm:$0xff]  ;;  %v53_v24 = vld [vmem:[%s1632_s2 + $0x48] sm:$0xff] }
   0x8   :  { %370 = vmatpush.msra.mxu3 %v89_v12  ;;  %331 = vmatpush.msra.mxu1 %v56_v10  ;;  %v107_v19 = vld [vmem:[%s1632_s2 + $0x1f8] sm:$0xff]  ;;  %v70_v21 = vld [vmem:[%s1632_s2 + $0xd0] sm:$0xff]  ;;  %v69_v25 = vld [vmem:[%s1632_s2 + $0xc8] sm:$0xff] }
   0x9   :  { %322 = vmatpush.msra.mxu0 %v301_v13  ;;  %351 = vmatpush.msra.mxu2 %v72_v11  ;;  %v86_v22 = vld [vmem:[%s1632_s2 + $0x150] sm:$0xff]  ;;  %v85_v26 = vld [vmem:[%s1632_s2 + $0x148] sm:$0xff]  ;;  %v52_v28 = vld [vmem:[%s1632_s2 + $0x40] sm:$0xff] }
   0xa   :  { %371 = vmatpush.msra.mxu3 %v88_v14  ;;  %332 = vmatpush.msra.mxu1 %v55_v16  ;;  %v106_v23 = vld [vmem:[%s1632_s2 + $0x1f0] sm:$0xff]  ;;  %v105_v27 = vld [vmem:[%s1632_s2 + $0x1e8] sm:$0xff]  ;;  %v68_v29 = vld [vmem:[%s1632_s2 + $0xc0] sm:$0xff] }
   0xb   :  { %323 = vmatpush.msra.mxu0 %v300_v15  ;;  %352 = vmatpush.msra.mxu2 %v71_v17  ;;  %v84_v30 = vld [vmem:[%s1632_s2 + $0x140] sm:$0xff]  ;;  %v51_v32 = vld [vmem:[%s1632_s2 + $0x38] sm:$0xff]  ;;  %v50_v36 = vld [vmem:[%s1632_s2 + $0x30] sm:$0xff] }
   0xc   :  { %372 = vmatpush.msra.mxu3 %v87_v18  ;;  %333 = vmatpush.msra.mxu1 %v54_v20  ;;  %v104_v31 = vld [vmem:[%s1632_s2 + $0x1e0] sm:$0xff]  ;;  %v67_v33 = vld [vmem:[%s1632_s2 + $0xb8] sm:$0xff]  ;;  %v66_v37 = vld [vmem:[%s1632_s2 + $0xb0] sm:$0xff] }
   0xd   :  { %388 = vmatpush.msrb.mxu0 %v107_v19  ;;  %353 = vmatpush.msra.mxu2 %v70_v21  ;;  %v83_v34 = vld [vmem:[%s1632_s2 + $0x138] sm:$0xff]  ;;  %v82_v38 = vld [vmem:[%s1632_s2 + $0x130] sm:$0xff]  ;;  %v49_v40 = vld [vmem:[%s1632_s2 + $0x28] sm:$0xff] }
   0xe   :  { %373 = vmatpush.msra.mxu3 %v86_v22  ;;  %334 = vmatpush.msra.mxu1 %v53_v24  ;;  %v103_v35 = vld [vmem:[%s1632_s2 + $0x1d8] sm:$0xff]  ;;  %v102_v39 = vld [vmem:[%s1632_s2 + $0x1d0] sm:$0xff]  ;;  %v65_v41 = vld [vmem:[%s1632_s2 + $0xa8] sm:$0xff] }
   0xf   :  { %389 = vmatpush.msrb.mxu0 %v106_v23  ;;  %354 = vmatpush.msra.mxu2 %v69_v25  ;;  %v81_v42 = vld [vmem:[%s1632_s2 + $0x128] sm:$0xff]  ;;  %v48_v44 = vld [vmem:[%s1632_s2 + $0x20] sm:$0xff]  ;;  %v47_v48 = vld [vmem:[%s1632_s2 + $0x18] sm:$0xff] }
  0x10   :  { %374 = vmatpush.msra.mxu3 %v85_v26  ;;  %335 = vmatpush.msra.mxu1 %v52_v28  ;;  %v101_v43 = vld [vmem:[%s1632_s2 + $0x1c8] sm:$0xff]  ;;  %v64_v45 = vld [vmem:[%s1632_s2 + $0xa0] sm:$0xff]  ;;  %v63_v49 = vld [vmem:[%s1632_s2 + $0x98] sm:$0xff] }
  0x11   :  { %390 = vmatpush.msrb.mxu0 %v105_v27  ;;  %355 = vmatpush.msra.mxu2 %v68_v29  ;;  %v80_v46 = vld [vmem:[%s1632_s2 + $0x120] sm:$0xff]  ;;  %v79_v50 = vld [vmem:[%s1632_s2 + $0x118] sm:$0xff]  ;;  %v46_v52 = vld [vmem:[%s1632_s2 + $0x10] sm:$0xff] }
  0x12   :  { %375 = vmatpush.msra.mxu3 %v84_v30  ;;  %336 = vmatpush.msra.mxu1 %v51_v32  ;;  %v100_v47 = vld [vmem:[%s1632_s2 + $0x1c0] sm:$0xff]  ;;  %v99_v51 = vld [vmem:[%s1632_s2 + $0x1b8] sm:$0xff]  ;;  %v62_v53 = vld [vmem:[%s1632_s2 + $0x90] sm:$0xff] }
  0x13   :  { %391 = vmatpush.msrb.mxu0 %v104_v31  ;;  %356 = vmatpush.msra.mxu2 %v67_v33  ;;  %v78_v54 = vld [vmem:[%s1632_s2 + $0x110] sm:$0xff]  ;;  %v45_v56 = vld [vmem:[%s1632_s2 + $0x8] sm:$0xff]  ;;  %v44_v60 = vld [vmem:[%s1632_s2] sm:$0xff] }
  0x14   :  { %376 = vmatpush.msra.mxu3 %v83_v34  ;;  %337 = vmatpush.msra.mxu1 %v50_v36  ;;  %v98_v55 = vld [vmem:[%s1632_s2 + $0x1b0] sm:$0xff]  ;;  %v61_v57 = vld [vmem:[%s1632_s2 + $0x88] sm:$0xff]  ;;  %v60_v61 = vld [vmem:[%s1632_s2 + $0x80] sm:$0xff] }
  0x15   :  { %392 = vmatpush.msrb.mxu0 %v103_v35  ;;  %357 = vmatpush.msra.mxu2 %v66_v37  ;;  %v77_v58 = vld [vmem:[%s1632_s2 + $0x108] sm:$0xff]  ;;  %v123_v62 = vld [vmem:[%s1632_s2 + $0x278] sm:$0xff]  ;;  %v76_v0 = vld [vmem:[%s1632_s2 + $0x100] sm:$0xff] }
  0x16   :  { %377 = vmatpush.msra.mxu3 %v82_v38  ;;  %338 = vmatpush.msra.mxu1 %v49_v40  ;;  %v97_v59 = vld [vmem:[%s1632_s2 + $0x1a8] sm:$0xff]  ;;  %v139_v63 = vld [vmem:[%s1632_s2 + $0x2f8] sm:$0xff]  ;;  %v96_v1 = vld [vmem:[%s1632_s2 + $0x1a0] sm:$0xff] }
  0x17   :  { %393 = vmatpush.msrb.mxu0 %v102_v39  ;;  %358 = vmatpush.msra.mxu2 %v65_v41  ;;  %v122_v2 = vld [vmem:[%s1632_s2 + $0x270] sm:$0xff]  ;;  %v155_v4 = vld [vmem:[%s1632_s2 + $0x378] sm:$0xff]  ;;  %v121_v6 = vld [vmem:[%s1632_s2 + $0x268] sm:$0xff] }
  0x18   :  { %378 = vmatpush.msra.mxu3 %v81_v42  ;;  %339 = vmatpush.msra.mxu1 %v48_v44  ;;  %v138_v3 = vld [vmem:[%s1632_s2 + $0x2f0] sm:$0xff]  ;;  %v95_v5 = vld [vmem:[%s1632_s2 + $0x198] sm:$0xff]  ;;  %v137_v7 = vld [vmem:[%s1632_s2 + $0x2e8] sm:$0xff] }
  0x19   :  { %394 = vmatpush.msrb.mxu0 %v101_v43  ;;  %359 = vmatpush.msra.mxu2 %v64_v45  ;;  %v154_v8 = vld [vmem:[%s1632_s2 + $0x370] sm:$0xff]  ;;  %v28_v10 = vld [vmem:[%s1630_s0 + $0x8] sm:$0xff]  ;;  %v120_v11 = vld [vmem:[%s1632_s2 + $0x260] sm:$0xff] }
  0x1a   :  { %379 = vmatpush.msra.mxu3 %v80_v46  ;;  %340 = vmatpush.msra.mxu1 %v47_v48  ;;  %v94_v9 = vld [vmem:[%s1632_s2 + $0x190] sm:$0xff]  ;;  %v136_v12 = vld [vmem:[%s1632_s2 + $0x2e0] sm:$0xff]  ;;  %v153_v13 = vld [vmem:[%s1632_s2 + $0x368] sm:$0xff] }
  0x1b   :  { %395 = vmatpush.msrb.mxu0 %v100_v47  ;;  %360 = vmatpush.msra.mxu2 %v63_v49  ;;  %v93_v14 = vld [vmem:[%s1632_s2 + $0x188] sm:$0xff]  ;;  %v29_v15 = vld [vmem:[%s1630_s0 + $0x10] sm:$0xff]  ;;  %v43_v16 = vld [vmem:[%s1631_s1] sm:$0xff] }
  0x1c   :  { %380 = vmatpush.msra.mxu3 %v79_v50  ;;  %341 = vmatpush.msra.mxu1 %v46_v52  ;;  %v119_v17 = vld [vmem:[%s1632_s2 + $0x258] sm:$0xff]  ;;  %v152_v19 = vld [vmem:[%s1632_s2 + $0x360] sm:$0xff]  ;;  %v118_v22 = vld [vmem:[%s1632_s2 + $0x250] sm:$0xff] }
  0x1d   :  { %396 = vmatpush.msrb.mxu0 %v99_v51  ;;  %361 = vmatpush.msra.mxu2 %v62_v53  ;;  %v135_v18 = vld [vmem:[%s1632_s2 + $0x2d8] sm:$0xff]  ;;  %v92_v20 = vld [vmem:[%s1632_s2 + $0x180] sm:$0xff]  ;;  %v134_v23 = vld [vmem:[%s1632_s2 + $0x2d0] sm:$0xff] }
  0x1e   :  { %381 = vmatpush.msra.mxu3 %v78_v54  ;;  %342 = vmatpush.msra.mxu1 %v45_v56  ;;  %v27_v21 = vld [vmem:[%s1630_s0] sm:$0xff]  ;;  %v151_v24 = vld [vmem:[%s1632_s2 + $0x358] sm:$0xff]  ;;  %v117_v26 = vld [vmem:[%s1632_s2 + $0x248] sm:$0xff] }
  0x1f   :  { %397 = vmatpush.msrb.mxu0 %v98_v55  ;;  %362 = vmatpush.msra.mxu2 %v61_v57  ;;  %v171_v25 = vld [vmem:[%s1632_s2 + $0x3f8] sm:$0xff]  ;;  %v133_v27 = vld [vmem:[%s1632_s2 + $0x2c8] sm:$0xff]  ;;  %v150_v28 = vld [vmem:[%s1632_s2 + $0x350] sm:$0xff] }
  0x20   :  { %382 = vmatpush.msra.mxu3 %v77_v58  ;;  %343 = vmatpush.msra.mxu1 %v44_v60  ;;  %v170_v29 = vld [vmem:[%s1632_s2 + $0x3f0] sm:$0xff]  ;;  %v116_v30 = vld [vmem:[%s1632_s2 + $0x240] sm:$0xff]  ;;  %v149_v32 = vld [vmem:[%s1632_s2 + $0x348] sm:$0xff] }
  0x21   :  { %398 = vmatpush.msrb.mxu0 %v97_v59  ;;  %363 = vmatpush.msra.mxu2 %v60_v61  ;;  %v132_v31 = vld [vmem:[%s1632_s2 + $0x2c0] sm:$0xff]  ;;  %v169_v33 = vld [vmem:[%s1632_s2 + $0x3e8] sm:$0xff]  ;;  %v30_v34 = vld [vmem:[%s1630_s0 + $0x18] sm:$0xff] }
  0x22   :  { %408 = vmatpush.msrb.mxu1 %v123_v62  ;;  %383 = vmatpush.msra.mxu3 %v76_v0  ;;  %v115_v35 = vld [vmem:[%s1632_s2 + $0x238] sm:$0xff]  ;;  %v148_v37 = vld [vmem:[%s1632_s2 + $0x340] sm:$0xff]  ;;  %v114_v39 = vld [vmem:[%s1632_s2 + $0x230] sm:$0xff] }
  0x23   :  { %428 = vmatpush.msrb.mxu2 %v139_v63  ;;  %399 = vmatpush.msrb.mxu0 %v96_v1  ;;  %v131_v36 = vld [vmem:[%s1632_s2 + $0x2b8] sm:$0xff]  ;;  %v168_v38 = vld [vmem:[%s1632_s2 + $0x3e0] sm:$0xff]  ;;  %v130_v40 = vld [vmem:[%s1632_s2 + $0x2b0] sm:$0xff] }
  0x24   :  { %409 = vmatpush.msrb.mxu1 %v122_v2  ;;  %448 = vmatpush.msrb.mxu3 %v155_v4  ;;  %v147_v41 = vld [vmem:[%s1632_s2 + $0x338] sm:$0xff]  ;;  %v113_v43 = vld [vmem:[%s1632_s2 + $0x228] sm:$0xff]  ;;  %v146_v45 = vld [vmem:[%s1632_s2 + $0x330] sm:$0xff] }
  0x25   :  { %429 = vmatpush.msrb.mxu2 %v138_v3  ;;  %400 = vmatpush.msrb.mxu0 %v95_v5  ;;  %v167_v42 = vld [vmem:[%s1632_s2 + $0x3d8] sm:$0xff]  ;;  %v129_v44 = vld [vmem:[%s1632_s2 + $0x2a8] sm:$0xff]  ;;  %v166_v46 = vld [vmem:[%s1632_s2 + $0x3d0] sm:$0xff] }
  0x26   :  { %410 = vmatpush.msrb.mxu1 %v121_v6  ;;  %449 = vmatpush.msrb.mxu3 %v154_v8  ;;  %v112_v47 = vld [vmem:[%s1632_s2 + $0x220] sm:$0xff]  ;;  %v145_v49 = vld [vmem:[%s1632_s2 + $0x328] sm:$0xff]  ;;  %v111_v51 = vld [vmem:[%s1632_s2 + $0x218] sm:$0xff] }
  0x27   :  { %430 = vmatpush.msrb.mxu2 %v137_v7  ;;  %401 = vmatpush.msrb.mxu0 %v94_v9  ;;  %v128_v48 = vld [vmem:[%s1632_s2 + $0x2a0] sm:$0xff]  ;;  %v165_v50 = vld [vmem:[%s1632_s2 + $0x3c8] sm:$0xff]  ;;  %v127_v52 = vld [vmem:[%s1632_s2 + $0x298] sm:$0xff] }
  0x28   :  { %364 = vmatmul.f32.vlgmr.msra.gmra.mxu2 %v28_v10  ;;  %411 = vmatpush.msrb.mxu1 %v120_v11  ;;  %v144_v53 = vld [vmem:[%s1632_s2 + $0x320] sm:$0xff]  ;;  %v110_v55 = vld [vmem:[%s1632_s2 + $0x210] sm:$0xff]  ;;  %v143_v57 = vld [vmem:[%s1632_s2 + $0x318] sm:$0xff] }
  0x29   :  { %431 = vmatpush.msrb.mxu2 %v136_v12  ;;  %450 = vmatpush.msrb.mxu3 %v153_v13  ;;  %v164_v54 = vld [vmem:[%s1632_s2 + $0x3c0] sm:$0xff]  ;;  %v126_v56 = vld [vmem:[%s1632_s2 + $0x290] sm:$0xff]  ;;  %v163_v58 = vld [vmem:[%s1632_s2 + $0x3b8] sm:$0xff] }
  0x2a   :  { %402 = vmatpush.msrb.mxu0 %v93_v14  ;;  %384 = vmatmul.f32.vlgmr.msra.gmra.mxu3 %v29_v15  ;;  %v109_v59 = vld [vmem:[%s1632_s2 + $0x208] sm:$0xff]  ;;  %v142_v61 = vld [vmem:[%s1632_s2 + $0x310] sm:$0xff]  ;;  %v108_v63 = vld [vmem:[%s1632_s2 + $0x200] sm:$0xff] }
  0x2b   :  { %703 = vmatmul.msk.f32.vlgmr.msra.gmra.mxu0 %vm304_vm0, %v43_v16  ;;  %412 = vmatpush.msrb.mxu1 %v119_v17  ;;  %v125_v60 = vld [vmem:[%s1632_s2 + $0x288] sm:$0xff]  ;;  %v162_v62 = vld [vmem:[%s1632_s2 + $0x3b0] sm:$0xff]  ;;  %v124_v0 = vld [vmem:[%s1632_s2 + $0x280] sm:$0xff] }
  0x2c   :  { %432 = vmatpush.msrb.mxu2 %v135_v18  ;;  %451 = vmatpush.msrb.mxu3 %v152_v19  ;;  %v141_v1 = vld [vmem:[%s1632_s2 + $0x308] sm:$0xff]  ;;  %v31_v3 = vld [vmem:[%s1630_s0 + $0x20] sm:$0xff]  ;;  %v187_v5 = vld [vmem:[%s1632_s2 + $0x478] sm:$0xff] }
  0x2d   :  { %403 = vmatpush.msrb.mxu0 %v92_v20  ;;  %344 = vmatmul.f32.vlgmr.msra.gmra.mxu1 %v27_v21  ;;  %v161_v2 = vld [vmem:[%s1632_s2 + $0x3a8] sm:$0xff]  ;;  %v203_v6 = vld [vmem:[%s1632_s2 + $0x4f8] sm:$0xff]  ;;  %v140_v7 = vld [vmem:[%s1632_s2 + $0x300] sm:$0xff] }
  0x2e   :  { %413 = vmatpush.msrb.mxu1 %v118_v22  ;;  %433 = vmatpush.msrb.mxu2 %v134_v23  ;;  %v32_v4 = vld [vmem:[%s1630_s0 + $0x28] sm:$0xff] }
  0x2f   :  { %452 = vmatpush.msrb.mxu3 %v151_v24  ;;  %468 = vmatpush.msra.mxu0 %v171_v25 }
  0x30   :  { %414 = vmatpush.msrb.mxu1 %v117_v26  ;;  %434 = vmatpush.msrb.mxu2 %v133_v27 }
  0x31   :  { %453 = vmatpush.msrb.mxu3 %v150_v28  ;;  %469 = vmatpush.msra.mxu0 %v170_v29 }
  0x32   :  { %415 = vmatpush.msrb.mxu1 %v116_v30  ;;  %435 = vmatpush.msrb.mxu2 %v132_v31 }
  0x33   :  { %454 = vmatpush.msrb.mxu3 %v149_v32  ;;  %470 = vmatpush.msra.mxu0 %v169_v33 }
  0x34   :  { %404 = vmatmul.f32.vlgmr.msrb.gmra.mxu0 %v30_v34  ;;  %416 = vmatpush.msrb.mxu1 %v115_v35 }
  0x35   :  { %436 = vmatpush.msrb.mxu2 %v131_v36  ;;  %455 = vmatpush.msrb.mxu3 %v148_v37 }
  0x36   :  { %471 = vmatpush.msra.mxu0 %v168_v38  ;;  %417 = vmatpush.msrb.mxu1 %v114_v39 }
  0x37   :  { %437 = vmatpush.msrb.mxu2 %v130_v40  ;;  %456 = vmatpush.msrb.mxu3 %v147_v41 }
  0x38   :  { %472 = vmatpush.msra.mxu0 %v167_v42  ;;  %418 = vmatpush.msrb.mxu1 %v113_v43 }
  0x39   :  { %438 = vmatpush.msrb.mxu2 %v129_v44  ;;  %457 = vmatpush.msrb.mxu3 %v146_v45 }
  0x3a   :  { %473 = vmatpush.msra.mxu0 %v166_v46  ;;  %419 = vmatpush.msrb.mxu1 %v112_v47 }
  0x3b   :  { %439 = vmatpush.msrb.mxu2 %v128_v48  ;;  %458 = vmatpush.msrb.mxu3 %v145_v49 }
  0x3c   :  { %474 = vmatpush.msra.mxu0 %v165_v50  ;;  %420 = vmatpush.msrb.mxu1 %v111_v51 }
  0x3d   :  { %440 = vmatpush.msrb.mxu2 %v127_v52  ;;  %459 = vmatpush.msrb.mxu3 %v144_v53 }
  0x3e   :  { %475 = vmatpush.msra.mxu0 %v164_v54  ;;  %421 = vmatpush.msrb.mxu1 %v110_v55 }
  0x3f   :  { %441 = vmatpush.msrb.mxu2 %v126_v56  ;;  %460 = vmatpush.msrb.mxu3 %v143_v57 }
  0x40   :  { %476 = vmatpush.msra.mxu0 %v163_v58  ;;  %422 = vmatpush.msrb.mxu1 %v109_v59 }
  0x41   :  { %442 = vmatpush.msrb.mxu2 %v125_v60  ;;  %461 = vmatpush.msrb.mxu3 %v142_v61 }
  0x42   :  { %477 = vmatpush.msra.mxu0 %v162_v62  ;;  %423 = vmatpush.msrb.mxu1 %v108_v63 }
  0x43   :  { %443 = vmatpush.msrb.mxu2 %v124_v0  ;;  %462 = vmatpush.msrb.mxu3 %v141_v1 }
  0x44   :  { %12 = vsyncpa [#allocation3], 0  ;;  %478 = vmatpush.msra.mxu0 %v161_v2  ;;  %424 = vmatmul.f32.vlgmr.msrb.gmra.mxu1 %v31_v3  ;;  %v160_v8 = vld [vmem:[%s1632_s2 + $0x3a0] sm:$0xff]  ;;  %v33_v9 = vld [vmem:[%s1630_s0 + $0x30] sm:$0xff]  ;;  %s734_s20 = smov [#allocation2]   ;;  %s694_s24 = sshll.u32 %s1637_s7, 4  ;;  %s695_s24 = int_to_ptr.hbm [resolvable:$true] %s694_s24 }
  0x45   :  { %444 = vmatmul.f32.vlgmr.msrb.gmra.mxu2 %v32_v4  ;;  %488 = vmatpush.msra.mxu1 %v187_v5  ;;  %v186_v10 = vld [vmem:[%s1632_s2 + $0x470] sm:$0xff]  ;;  %v219_v12 = vld [vmem:[%s1632_s2 + $0x578] sm:$0xff]  ;;  %v185_v14 = vld [vmem:[%s1632_s2 + $0x468] sm:$0xff]  ;;  %s692_s21 = sshll.u32 %s734_s20, 4  ;;  %s693_s21 = int_to_ptr.vmem [resolvable:$true] %s692_s21 }
  0x46   :  { %v202_v11 = vld [vmem:[%s1632_s2 + $0x4f0] sm:$0xff]  ;;  %508 = vmatpush.msra.mxu2 %v203_v6  ;;  %463 = vmatpush.msrb.mxu3 %v140_v7  ;;  %v159_v13 = vld [vmem:[%s1632_s2 + $0x398] sm:$0xff]  ;;  %v201_v15 = vld [vmem:[%s1632_s2 + $0x4e8] sm:$0xff] }
  0x47   :  { %479 = vmatpush.msra.mxu0 %v160_v8  ;;  %464 = vmatmul.f32.vlgmr.msrb.gmra.mxu3 %v33_v9  ;;  %v218_v16 = vld [vmem:[%s1632_s2 + $0x570] sm:$0xff]  ;;  %v184_v18 = vld [vmem:[%s1632_s2 + $0x460] sm:$0xff]  ;;  %v217_v20 = vld [vmem:[%s1632_s2 + $0x568] sm:$0xff] }
  0x48   :  { %489 = vmatpush.msra.mxu1 %v186_v10  ;;  %509 = vmatpush.msra.mxu2 %v202_v11  ;;  %v158_v17 = vld [vmem:[%s1632_s2 + $0x390] sm:$0xff]  ;;  %v200_v19 = vld [vmem:[%s1632_s2 + $0x4e0] sm:$0xff]  ;;  %v157_v21 = vld [vmem:[%s1632_s2 + $0x388] sm:$0xff] }
  0x49   :  { %528 = vmatpush.msra.mxu3 %v219_v12  ;;  %480 = vmatpush.msra.mxu0 %v159_v13  ;;  %v183_v22 = vld [vmem:[%s1632_s2 + $0x458] sm:$0xff]  ;;  %v216_v24 = vld [vmem:[%s1632_s2 + $0x560] sm:$0xff]  ;;  %v182_v27 = vld [vmem:[%s1632_s2 + $0x450] sm:$0xff] }
  0x4a   :  { %490 = vmatpush.msra.mxu1 %v185_v14  ;;  %510 = vmatpush.msra.mxu2 %v201_v15  ;;  %v199_v23 = vld [vmem:[%s1632_s2 + $0x4d8] sm:$0xff]  ;;  %v156_v25 = vld [vmem:[%s1632_s2 + $0x380] sm:$0xff]  ;;  %v198_v28 = vld [vmem:[%s1632_s2 + $0x4d0] sm:$0xff] }
  0x4b   :  { %529 = vmatpush.msra.mxu3 %v218_v16  ;;  %481 = vmatpush.msra.mxu0 %v158_v17  ;;  %v34_v26 = vld [vmem:[%s1630_s0 + $0x38] sm:$0xff]  ;;  %v181_v31 = vld [vmem:[%s1632_s2 + $0x448] sm:$0xff]  ;;  %v214_v33 = vld [vmem:[%s1632_s2 + $0x550] sm:$0xff] }
  0x4c   :  { %491 = vmatpush.msra.mxu1 %v184_v18  ;;  %511 = vmatpush.msra.mxu2 %v200_v19  ;;  %v215_v29 = vld [vmem:[%s1632_s2 + $0x558] sm:$0xff]  ;;  %v197_v32 = vld [vmem:[%s1632_s2 + $0x4c8] sm:$0xff]  ;;  %v234_v34 = vld [vmem:[%s1632_s2 + $0x5f0] sm:$0xff] }
  0x4d   :  { %530 = vmatpush.msra.mxu3 %v217_v20  ;;  %482 = vmatpush.msra.mxu0 %v157_v21  ;;  %v235_v30 = vld [vmem:[%s1632_s2 + $0x5f8] sm:$0xff]  ;;  %v180_v35 = vld [vmem:[%s1632_s2 + $0x440] sm:$0xff]  ;;  %v213_v37 = vld [vmem:[%s1632_s2 + $0x548] sm:$0xff] }
  0x4e   :  { %492 = vmatpush.msra.mxu1 %v183_v22  ;;  %512 = vmatpush.msra.mxu2 %v199_v23  ;;  %v196_v36 = vld [vmem:[%s1632_s2 + $0x4c0] sm:$0xff]  ;;  %v233_v38 = vld [vmem:[%s1632_s2 + $0x5e8] sm:$0xff]  ;;  %v179_v39 = vld [vmem:[%s1632_s2 + $0x438] sm:$0xff] }
  0x4f   :  { %531 = vmatpush.msra.mxu3 %v216_v24  ;;  %483 = vmatpush.msra.mxu0 %v156_v25  ;;  %v195_v40 = vld [vmem:[%s1632_s2 + $0x4b8] sm:$0xff]  ;;  %v212_v41 = vld [vmem:[%s1632_s2 + $0x540] sm:$0xff]  ;;  %v178_v43 = vld [vmem:[%s1632_s2 + $0x430] sm:$0xff] }
  0x50   :  { %484 = vmatmul.f32.vlgmr.msra.gmra.mxu0 %v34_v26  ;;  %493 = vmatpush.msra.mxu1 %v182_v27  ;;  %v232_v42 = vld [vmem:[%s1632_s2 + $0x5e0] sm:$0xff]  ;;  %v194_v44 = vld [vmem:[%s1632_s2 + $0x4b0] sm:$0xff]  ;;  %v211_v45 = vld [vmem:[%s1632_s2 + $0x538] sm:$0xff] }
  0x51   :  { %513 = vmatpush.msra.mxu2 %v198_v28  ;;  %532 = vmatpush.msra.mxu3 %v215_v29  ;;  %v231_v46 = vld [vmem:[%s1632_s2 + $0x5d8] sm:$0xff]  ;;  %v177_v47 = vld [vmem:[%s1632_s2 + $0x428] sm:$0xff]  ;;  %v210_v49 = vld [vmem:[%s1632_s2 + $0x530] sm:$0xff] }
  0x52   :  { %548 = vmatpush.msrb.mxu0 %v235_v30  ;;  %494 = vmatpush.msra.mxu1 %v181_v31  ;;  %v193_v48 = vld [vmem:[%s1632_s2 + $0x4a8] sm:$0xff]  ;;  %v230_v50 = vld [vmem:[%s1632_s2 + $0x5d0] sm:$0xff]  ;;  %v176_v51 = vld [vmem:[%s1632_s2 + $0x420] sm:$0xff] }
  0x53   :  { %514 = vmatpush.msra.mxu2 %v197_v32  ;;  %533 = vmatpush.msra.mxu3 %v214_v33  ;;  %v192_v52 = vld [vmem:[%s1632_s2 + $0x4a0] sm:$0xff]  ;;  %v209_v53 = vld [vmem:[%s1632_s2 + $0x528] sm:$0xff]  ;;  %v175_v55 = vld [vmem:[%s1632_s2 + $0x418] sm:$0xff] }
  0x54   :  { %549 = vmatpush.msrb.mxu0 %v234_v34  ;;  %495 = vmatpush.msra.mxu1 %v180_v35  ;;  %v229_v54 = vld [vmem:[%s1632_s2 + $0x5c8] sm:$0xff]  ;;  %v191_v56 = vld [vmem:[%s1632_s2 + $0x498] sm:$0xff]  ;;  %v208_v57 = vld [vmem:[%s1632_s2 + $0x520] sm:$0xff] }
  0x55   :  { %515 = vmatpush.msra.mxu2 %v196_v36  ;;  %534 = vmatpush.msra.mxu3 %v213_v37  ;;  %v228_v58 = vld [vmem:[%s1632_s2 + $0x5c0] sm:$0xff]  ;;  %v174_v59 = vld [vmem:[%s1632_s2 + $0x410] sm:$0xff]  ;;  %v207_v61 = vld [vmem:[%s1632_s2 + $0x518] sm:$0xff] }
  0x56   :  { %550 = vmatpush.msrb.mxu0 %v233_v38  ;;  %496 = vmatpush.msra.mxu1 %v179_v39  ;;  %v190_v60 = vld [vmem:[%s1632_s2 + $0x490] sm:$0xff]  ;;  %v227_v62 = vld [vmem:[%s1632_s2 + $0x5b8] sm:$0xff]  ;;  %v173_v63 = vld [vmem:[%s1632_s2 + $0x408] sm:$0xff] }
  0x57   :  { %516 = vmatpush.msra.mxu2 %v195_v40  ;;  %535 = vmatpush.msra.mxu3 %v212_v41  ;;  %v189_v0 = vld [vmem:[%s1632_s2 + $0x488] sm:$0xff]  ;;  %v206_v1 = vld [vmem:[%s1632_s2 + $0x510] sm:$0xff]  ;;  %v172_v3 = vld [vmem:[%s1632_s2 + $0x400] sm:$0xff] }
  0x58   :  { %551 = vmatpush.msrb.mxu0 %v232_v42  ;;  %497 = vmatpush.msra.mxu1 %v178_v43  ;;  %v226_v2 = vld [vmem:[%s1632_s2 + $0x5b0] sm:$0xff]  ;;  %v188_v4 = vld [vmem:[%s1632_s2 + $0x480] sm:$0xff]  ;;  %v205_v5 = vld [vmem:[%s1632_s2 + $0x508] sm:$0xff] }
  0x59   :  { %517 = vmatpush.msra.mxu2 %v194_v44  ;;  %536 = vmatpush.msra.mxu3 %v211_v45  ;;  %v225_v6 = vld [vmem:[%s1632_s2 + $0x5a8] sm:$0xff]  ;;  %v35_v7 = vld [vmem:[%s1630_s0 + $0x40] sm:$0xff]  ;;  %v251_v9 = vld [vmem:[%s1632_s2 + $0x678] sm:$0xff] }
  0x5a   :  { %552 = vmatpush.msrb.mxu0 %v231_v46  ;;  %498 = vmatpush.msra.mxu1 %v177_v47  ;;  %v36_v8 = vld [vmem:[%s1630_s0 + $0x48] sm:$0xff]  ;;  %v267_v10 = vld [vmem:[%s1632_s2 + $0x6f8] sm:$0xff]  ;;  %v204_v11 = vld [vmem:[%s1632_s2 + $0x500] sm:$0xff] }
  0x5b   :  { %518 = vmatpush.msra.mxu2 %v193_v48  ;;  %537 = vmatpush.msra.mxu3 %v210_v49  ;;  %v224_v12 = vld [vmem:[%s1632_s2 + $0x5a0] sm:$0xff]  ;;  %v37_v13 = vld [vmem:[%s1630_s0 + $0x50] sm:$0xff]  ;;  %v283_v16 = vld [vmem:[%s1632_s2 + $0x778] sm:$0xff] }
  0x5c   :  { %553 = vmatpush.msrb.mxu0 %v230_v50  ;;  %499 = vmatpush.msra.mxu1 %v176_v51  ;;  %v250_v14 = vld [vmem:[%s1632_s2 + $0x670] sm:$0xff]  ;;  %v223_v17 = vld [vmem:[%s1632_s2 + $0x598] sm:$0xff]  ;;  %v249_v18 = vld [vmem:[%s1632_s2 + $0x668] sm:$0xff] }
  0x5d   :  { %519 = vmatpush.msra.mxu2 %v192_v52  ;;  %538 = vmatpush.msra.mxu3 %v209_v53  ;;  %v266_v15 = vld [vmem:[%s1632_s2 + $0x6f0] sm:$0xff]  ;;  %v265_v19 = vld [vmem:[%s1632_s2 + $0x6e8] sm:$0xff]  ;;  %v248_v22 = vld [vmem:[%s1632_s2 + $0x660] sm:$0xff] }
  0x5e   :  { %554 = vmatpush.msrb.mxu0 %v229_v54  ;;  %500 = vmatpush.msra.mxu1 %v175_v55  ;;  %v282_v20 = vld [vmem:[%s1632_s2 + $0x770] sm:$0xff]  ;;  %v264_v23 = vld [vmem:[%s1632_s2 + $0x6e0] sm:$0xff]  ;;  %v281_v24 = vld [vmem:[%s1632_s2 + $0x768] sm:$0xff] }
  0x5f   :  { %520 = vmatpush.msra.mxu2 %v191_v56  ;;  %539 = vmatpush.msra.mxu3 %v208_v57  ;;  %v222_v21 = vld [vmem:[%s1632_s2 + $0x590] sm:$0xff]  ;;  %v221_v25 = vld [vmem:[%s1632_s2 + $0x588] sm:$0xff]  ;;  %v247_v26 = vld [vmem:[%s1632_s2 + $0x658] sm:$0xff] }
  0x60   :  { %555 = vmatpush.msrb.mxu0 %v228_v58  ;;  %501 = vmatpush.msra.mxu1 %v174_v59  ;;  %v263_v27 = vld [vmem:[%s1632_s2 + $0x6d8] sm:$0xff]  ;;  %v280_v28 = vld [vmem:[%s1632_s2 + $0x760] sm:$0xff]  ;;  %v246_v31 = vld [vmem:[%s1632_s2 + $0x650] sm:$0xff] }
  0x61   :  { %521 = vmatpush.msra.mxu2 %v190_v60  ;;  %540 = vmatpush.msra.mxu3 %v207_v61  ;;  %v220_v29 = vld [vmem:[%s1632_s2 + $0x580] sm:$0xff]  ;;  %v38_v30 = vld [vmem:[%s1630_s0 + $0x58] sm:$0xff]  ;;  %v262_v32 = vld [vmem:[%s1632_s2 + $0x6d0] sm:$0xff] }
  0x62   :  { %556 = vmatpush.msrb.mxu0 %v227_v62  ;;  %502 = vmatpush.msra.mxu1 %v173_v63  ;;  %v279_v33 = vld [vmem:[%s1632_s2 + $0x758] sm:$0xff]  ;;  %v245_v35 = vld [vmem:[%s1632_s2 + $0x648] sm:$0xff]  ;;  %v278_v37 = vld [vmem:[%s1632_s2 + $0x750] sm:$0xff] }
  0x63   :  { %522 = vmatpush.msra.mxu2 %v189_v0  ;;  %541 = vmatpush.msra.mxu3 %v206_v1  ;;  %v299_v34 = vld [vmem:[%s1632_s2 + $0x7f8] sm:$0xff]  ;;  %v261_v36 = vld [vmem:[%s1632_s2 + $0x6c8] sm:$0xff]  ;;  %v298_v38 = vld [vmem:[%s1632_s2 + $0x7f0] sm:$0xff] }
  0x64   :  { %557 = vmatpush.msrb.mxu0 %v226_v2  ;;  %503 = vmatpush.msra.mxu1 %v172_v3  ;;  %v244_v39 = vld [vmem:[%s1632_s2 + $0x640] sm:$0xff]  ;;  %v277_v41 = vld [vmem:[%s1632_s2 + $0x748] sm:$0xff]  ;;  %v243_v43 = vld [vmem:[%s1632_s2 + $0x638] sm:$0xff] }
  0x65   :  { %523 = vmatpush.msra.mxu2 %v188_v4  ;;  %542 = vmatpush.msra.mxu3 %v205_v5  ;;  %v260_v40 = vld [vmem:[%s1632_s2 + $0x6c0] sm:$0xff]  ;;  %v297_v42 = vld [vmem:[%s1632_s2 + $0x7e8] sm:$0xff]  ;;  %v259_v44 = vld [vmem:[%s1632_s2 + $0x6b8] sm:$0xff] }
  0x66   :  { %558 = vmatpush.msrb.mxu0 %v225_v6  ;;  %504 = vmatmul.f32.vlgmr.msra.gmra.mxu1 %v35_v7  ;;  %v276_v45 = vld [vmem:[%s1632_s2 + $0x740] sm:$0xff]  ;;  %v242_v47 = vld [vmem:[%s1632_s2 + $0x630] sm:$0xff]  ;;  %v275_v49 = vld [vmem:[%s1632_s2 + $0x738] sm:$0xff] }
  0x67   :  { %524 = vmatmul.f32.vlgmr.msra.gmra.mxu2 %v36_v8  ;;  %568 = vmatpush.msrb.mxu1 %v251_v9  ;;  %v296_v46 = vld [vmem:[%s1632_s2 + $0x7e0] sm:$0xff]  ;;  %v258_v48 = vld [vmem:[%s1632_s2 + $0x6b0] sm:$0xff]  ;;  %v295_v50 = vld [vmem:[%s1632_s2 + $0x7d8] sm:$0xff] }
  0x68   :  { %588 = vmatpush.msrb.mxu2 %v267_v10  ;;  %543 = vmatpush.msra.mxu3 %v204_v11  ;;  %v241_v51 = vld [vmem:[%s1632_s2 + $0x628] sm:$0xff]  ;;  %v274_v53 = vld [vmem:[%s1632_s2 + $0x730] sm:$0xff]  ;;  %v240_v55 = vld [vmem:[%s1632_s2 + $0x620] sm:$0xff] }
  0x69   :  { %559 = vmatpush.msrb.mxu0 %v224_v12  ;;  %544 = vmatmul.f32.vlgmr.msra.gmra.mxu3 %v37_v13  ;;  %v257_v52 = vld [vmem:[%s1632_s2 + $0x6a8] sm:$0xff]  ;;  %v294_v54 = vld [vmem:[%s1632_s2 + $0x7d0] sm:$0xff]  ;;  %v256_v56 = vld [vmem:[%s1632_s2 + $0x6a0] sm:$0xff] }
  0x6a   :  { %569 = vmatpush.msrb.mxu1 %v250_v14  ;;  %589 = vmatpush.msrb.mxu2 %v266_v15  ;;  %v273_v57 = vld [vmem:[%s1632_s2 + $0x728] sm:$0xff]  ;;  %v239_v59 = vld [vmem:[%s1632_s2 + $0x618] sm:$0xff]  ;;  %v272_v61 = vld [vmem:[%s1632_s2 + $0x720] sm:$0xff] }
  0x6b   :  { %608 = vmatpush.msrb.mxu3 %v283_v16  ;;  %560 = vmatpush.msrb.mxu0 %v223_v17  ;;  %v293_v58 = vld [vmem:[%s1632_s2 + $0x7c8] sm:$0xff]  ;;  %v255_v60 = vld [vmem:[%s1632_s2 + $0x698] sm:$0xff]  ;;  %v292_v62 = vld [vmem:[%s1632_s2 + $0x7c0] sm:$0xff] }
  0x6c   :  { %570 = vmatpush.msrb.mxu1 %v249_v18  ;;  %590 = vmatpush.msrb.mxu2 %v265_v19  ;;  %v238_v63 = vld [vmem:[%s1632_s2 + $0x610] sm:$0xff]  ;;  %v271_v1 = vld [vmem:[%s1632_s2 + $0x718] sm:$0xff]  ;;  %v237_v3 = vld [vmem:[%s1632_s2 + $0x608] sm:$0xff] }
  0x6d   :  { %609 = vmatpush.msrb.mxu3 %v282_v20  ;;  %561 = vmatpush.msrb.mxu0 %v222_v21  ;;  %v254_v0 = vld [vmem:[%s1632_s2 + $0x690] sm:$0xff]  ;;  %v291_v2 = vld [vmem:[%s1632_s2 + $0x7b8] sm:$0xff]  ;;  %v253_v4 = vld [vmem:[%s1632_s2 + $0x688] sm:$0xff] }
  0x6e   :  { %571 = vmatpush.msrb.mxu1 %v248_v22  ;;  %591 = vmatpush.msrb.mxu2 %v264_v23  ;;  %v270_v5 = vld [vmem:[%s1632_s2 + $0x710] sm:$0xff]  ;;  %v236_v7 = vld [vmem:[%s1632_s2 + $0x600] sm:$0xff]  ;;  %v269_v9 = vld [vmem:[%s1632_s2 + $0x708] sm:$0xff] }
  0x6f   :  { %610 = vmatpush.msrb.mxu3 %v281_v24  ;;  %562 = vmatpush.msrb.mxu0 %v221_v25  ;;  %v290_v6 = vld [vmem:[%s1632_s2 + $0x7b0] sm:$0xff]  ;;  %v252_v8 = vld [vmem:[%s1632_s2 + $0x680] sm:$0xff]  ;;  %v289_v10 = vld [vmem:[%s1632_s2 + $0x7a8] sm:$0xff] }
  0x70   :  { %572 = vmatpush.msrb.mxu1 %v247_v26  ;;  %592 = vmatpush.msrb.mxu2 %v263_v27  ;;  %v39_v11 = vld [vmem:[%s1630_s0 + $0x60] sm:$0xff]  ;;  %v40_v12 = vld [vmem:[%s1630_s0 + $0x68] sm:$0xff]  ;;  %v41_v15 = vld [vmem:[%s1630_s0 + $0x70] sm:$0xff] }
  0x71   :  { %611 = vmatpush.msrb.mxu3 %v280_v28  ;;  %563 = vmatpush.msrb.mxu0 %v220_v29  ;;  %v268_v13 = vld [vmem:[%s1632_s2 + $0x700] sm:$0xff]  ;;  %v287_v16 = vld [vmem:[%s1632_s2 + $0x798] sm:$0xff]  ;;  %v286_v17 = vld [vmem:[%s1632_s2 + $0x790] sm:$0xff] }
  0x72   :  { %564 = vmatmul.f32.vlgmr.msrb.gmra.mxu0 %v38_v30  ;;  %573 = vmatpush.msrb.mxu1 %v246_v31  ;;  %v288_v14 = vld [vmem:[%s1632_s2 + $0x7a0] sm:$0xff]  ;;  %v285_v18 = vld [vmem:[%s1632_s2 + $0x788] sm:$0xff]  ;;  %v42_v20 = vld [vmem:[%s1630_s0 + $0x78] sm:$0xff] }
  0x73   :  { %593 = vmatpush.msrb.mxu2 %v262_v32  ;;  %612 = vmatpush.msrb.mxu3 %v279_v33  ;;  %v284_v19 = vld [vmem:[%s1632_s2 + $0x780] sm:$0xff]  ;;  %v657_v29 = vld [vmem:[%s1635_s5 + $0x18] sm:$0xff]  ;;  %v656_v32 = vld [vmem:[%s1635_s5 + $0x10] sm:$0xff] }
  0x74   :  { %628 = vmatpush.msra.mxu0 %v299_v34  ;;  %574 = vmatpush.msrb.mxu1 %v245_v35  ;;  %v655_v35 = vld [vmem:[%s1635_s5 + $0x8] sm:$0xff] }
  0x75   :  { %594 = vmatpush.msrb.mxu2 %v261_v36  ;;  %613 = vmatpush.msrb.mxu3 %v278_v37  ;;  %v654_v37 = vld [vmem:[%s1635_s5] sm:$0xff] }
  0x76   :  { %629 = vmatpush.msra.mxu0 %v298_v38  ;;  %575 = vmatpush.msrb.mxu1 %v244_v39 }
  0x77   :  { %595 = vmatpush.msrb.mxu2 %v260_v40  ;;  %614 = vmatpush.msrb.mxu3 %v277_v41 }
  0x78   :  { %630 = vmatpush.msra.mxu0 %v297_v42  ;;  %576 = vmatpush.msrb.mxu1 %v243_v43 }
  0x79   :  { %596 = vmatpush.msrb.mxu2 %v259_v44  ;;  %615 = vmatpush.msrb.mxu3 %v276_v45 }
  0x7a   :  { %631 = vmatpush.msra.mxu0 %v296_v46  ;;  %577 = vmatpush.msrb.mxu1 %v242_v47 }
  0x7b   :  { %597 = vmatpush.msrb.mxu2 %v258_v48  ;;  %616 = vmatpush.msrb.mxu3 %v275_v49 }
  0x7c   :  { %632 = vmatpush.msra.mxu0 %v295_v50  ;;  %578 = vmatpush.msrb.mxu1 %v241_v51 }
  0x7d   :  { %598 = vmatpush.msrb.mxu2 %v257_v52  ;;  %617 = vmatpush.msrb.mxu3 %v274_v53 }
  0x7e   :  { %633 = vmatpush.msra.mxu0 %v294_v54  ;;  %579 = vmatpush.msrb.mxu1 %v240_v55 }
  0x7f   :  { %599 = vmatpush.msrb.mxu2 %v256_v56  ;;  %618 = vmatpush.msrb.mxu3 %v273_v57  ;;  %v706_v56 = vld [vmem:[%s1634_s4] ss:$0 sm:$0xff] }
  0x80   :  { %634 = vmatpush.msra.mxu0 %v293_v58  ;;  %580 = vmatpush.msrb.mxu1 %v239_v59 }
  0x81   :  { %600 = vmatpush.msrb.mxu2 %v255_v60  ;;  %619 = vmatpush.msrb.mxu3 %v272_v61  ;;  %v707_v61 = vld [vmem:[%s1636_s6] ss:$0 sm:$0xff] }
  0x82   :  { %635 = vmatpush.msra.mxu0 %v292_v62  ;;  %581 = vmatpush.msrb.mxu1 %v238_v63 }
  0x83   :  { %601 = vmatpush.msrb.mxu2 %v254_v0  ;;  %620 = vmatpush.msrb.mxu3 %v271_v1 }
  0x84   :  { %636 = vmatpush.msra.mxu0 %v291_v2  ;;  %582 = vmatpush.msrb.mxu1 %v237_v3 }
  0x85   :  { %602 = vmatpush.msrb.mxu2 %v253_v4  ;;  %621 = vmatpush.msrb.mxu3 %v270_v5 }
  0x86   :  { %637 = vmatpush.msra.mxu0 %v290_v6  ;;  %583 = vmatpush.msrb.mxu1 %v236_v7 }
  0x87   :  { %603 = vmatpush.msrb.mxu2 %v252_v8  ;;  %622 = vmatpush.msrb.mxu3 %v269_v9 }
  0x88   :  { %638 = vmatpush.msra.mxu0 %v289_v10  ;;  %584 = vmatmul.f32.vlgmr.msrb.gmra.mxu1 %v39_v11 }
  0x89   :  { %604 = vmatmul.f32.vlgmr.msrb.gmra.mxu2 %v40_v12  ;;  %623 = vmatpush.msrb.mxu3 %v268_v13 }
  0x8a   :  { %639 = vmatpush.msra.mxu0 %v288_v14  ;;  %624 = vmatmul.f32.vlgmr.msrb.gmra.mxu3 %v41_v15 }
  0x8b   :  { %677 = vmatpush.msra.mxu1 %v657_v29 }
  0x8c   :  { %640 = vmatpush.msra.mxu0 %v287_v16 }
  0x8d   :  { %678 = vmatpush.msra.mxu1 %v656_v32 }
  0x8e   :  { %641 = vmatpush.msra.mxu0 %v286_v17 }
  0x8f   :  { %679 = vmatpush.msra.mxu1 %v655_v35 }
  0x90   :  { %642 = vmatpush.msra.mxu0 %v285_v18 }
  0x91   :  { %680 = vmatpush.msra.mxu1 %v654_v37 }
  0x92   :  { %643 = vmatpush.msra.mxu0 %v284_v19 }
  0x93   :  { %644 = vmatmul.f32.vlgmr.msra.gmra.mxu0 %v42_v20 }
  0xa8   :  { %v325_v22 = vpop.f32.mrf.mxu0 }
  0xaa   :  { %v345_v21 = vpop.f32.mrf.mxu1 }
  0xab   :  { %v346_v23 = vadd.f32 %v345_v21, %v325_v22  ;;  %v365_v24 = vpop.f32.mrf.mxu2 }
  0xad   :  { %v366_v25 = vadd.f32 %v365_v24, %v346_v23  ;;  %v385_v26 = vpop.f32.mrf.mxu3 }
  0xaf   :  { %v386_v27 = vadd.f32 %v385_v26, %v366_v25 }
  0xb1   :  { %v405_v28 = vpop.f32.mrf.mxu0 }
  0xb2   :  { %v406_v31 = vadd.f32 %v405_v28, %v386_v27 }
  0xc1   :  { %v425_v30 = vpop.f32.mrf.mxu1 }
  0xc2   :  { %v426_v34 = vadd.f32 %v425_v30, %v406_v31 }
  0xc8   :  { %v445_v33 = vpop.f32.mrf.mxu2 }
  0xc9   :  { %v446_v36 = vadd.f32 %v445_v33, %v426_v34 }
  0xca   :  { %v465_v38 = vpop.f32.mrf.mxu3 }
  0xcb   :  { %v466_v39 = vadd.f32 %v465_v38, %v446_v36 }
  0xcd   :  { %v485_v40 = vpop.f32.mrf.mxu0 }
  0xce   :  { %v486_v42 = vadd.f32 %v485_v40, %v466_v39 }
  0xe3   :  { %v505_v41 = vpop.f32.mrf.mxu1 }
  0xe4   :  { %v506_v44 = vadd.f32 %v505_v41, %v486_v42 }
  0xea   :  { %v525_v43 = vpop.f32.mrf.mxu2 }
  0xeb   :  { %v526_v45 = vadd.f32 %v525_v43, %v506_v44 }
  0xec   :  { %v545_v46 = vpop.f32.mrf.mxu3 }
  0xed   :  { %v546_v47 = vadd.f32 %v545_v46, %v526_v45 }
  0xef   :  { %v565_v48 = vpop.f32.mrf.mxu0 }
  0xf0   :  { %v566_v50 = vadd.f32 %v565_v48, %v546_v47 }
 0x105   :  { %v585_v49 = vpop.f32.mrf.mxu1 }
 0x106   :  { %v586_v51 = vadd.f32 %v585_v49, %v566_v50 }
 0x10c   :  { %v605_v52 = vpop.f32.mrf.mxu2 }
 0x10d   :  { %v606_v53 = vadd.f32 %v605_v52, %v586_v51  ;;  %v625_v54 = vpop.f32.mrf.mxu3 }
 0x10f   :  { %v626_v55 = vadd.f32 %v625_v54, %v606_v53 }
 0x110   :  { %v645_v57 = vpop.f32.mrf.mxu0 }
 0x111   :  { %v646_v58 = vadd.f32 %v645_v57, %v626_v55 }
 0x113   :  { %v652_v59 = vadd.f32 %v706_v56, %v646_v58 }
 0x115   :  { %v653_v60 = vmax.f32 %v652_v59, 0.0 }
 0x117   :  { %704 = vmatmul.msk.f32.vlgmr.msra.gmra.mxu1 %vm304_vm0, %v653_v60 }
 0x194   :  { %v682_v62 = vpop.f32.mrf.mxu1 }
 0x195   :  { %v683_v63 = vadd.f32 %v707_v61, %v682_v62 }
 0x197   :  { %v685_v0 = vmax.f32 %v683_v63, 0.0 }
 0x199   :  { %686 = vst.msk [vmem:[#allocation2] sm:$0xff] %vm304_vm0, %v685_v0 }
 0x19a   :  { %697 = dma.vmem_to_hbm [thread:$0]  %s693_s21, 128, %s695_s24, [#allocation3]  }
 0x19b   :  { %732 = dma.done.wait [#allocation3], 128  }
 0x19c   :  { %733 = vsyncadd [#allocation3], 4294967168 }
 0x19d   :  { %702 = vsyncpa [#allocation3], 1 }

</bundles_post_ra>
